<compile_context>
chip_gen: v6e
topology: v6e:2x2x1
jax: 0.10.0
libtpu: 0.0.40
codegen_flags: <defaults>
</compile_context>

<pallas_src>
import functools

import jax
import jax.numpy as jnp
from jax.experimental import pallas as pl
from jax.experimental.pallas import tpu as pltpu


def _layernorm_kernel(x_ref, g_ref, b_ref, o_ref, *, epsilon, inv_n, inv_nm1):
    x = x_ref[...].astype(jnp.float32)
    # mean over the last (feature) dim; constant-reciprocal multiply instead of a divide
    mean = jnp.sum(x, axis=-1, keepdims=True) * inv_n
    diff = x - mean
    # torch.var default is unbiased (divides by N-1); again a constant-reciprocal
    # multiply keeps this on the VPU instead of the divide path.
    var = jnp.sum(diff * diff, axis=-1, keepdims=True) * inv_nm1
    # rsqrt goes to the EUP slot (effectively free next to the VALU work).
    inv = jax.lax.rsqrt(var + epsilon)
    # gamma/beta blocks are tiny (1, dim) and resident across the grid
    # (constant index_map); cast cost is negligible per step.
    gamma = g_ref[...].astype(jnp.float32)
    beta = b_ref[...].astype(jnp.float32)
    o_ref[...] = (diff * inv * gamma + beta).astype(o_ref.dtype)


# Keep the double-buffered (in + out) working set comfortably inside the smallest
# per-generation VMEM (v7x: 64 MiB physical, 32 MiB scoped default).
_VMEM_WORKING_SET_BUDGET = 16 * 1024 * 1024  # bytes
_VMEM_LIMIT_BYTES = 32 * 1024 * 1024
_MAX_ROW_TILE = 2048  # large tiles amortize the ~0.35 us per-grid-step overhead


def _pick_row_tile(n_rows, dim, itemsize):
    """Pick the largest row tile that fits the VMEM budget, sublane-aligned."""
    # per grid step: 2 arrays (in + out) x 2 buffers (pipeline) x row_tile x dim x itemsize
    max_rows_by_vmem = max(8, _VMEM_WORKING_SET_BUDGET // (4 * dim * itemsize))
    tile = min(_MAX_ROW_TILE, max_rows_by_vmem, n_rows)
    if n_rows <= tile:
        # Whole array in one block: block_shape == full array dims is always legal.
        return n_rows
    # sublane alignment: 8 rows for 32-bit, 16 for 16-bit packed dtypes
    align = 8 if itemsize >= 4 else 16
    return max(align, (tile // align) * align)


def layer_normalization(x, gamma, beta, epsilon=1e-5, *, row_tile=None):
    """LayerNormalization forward: normalize over last dim, unbiased variance."""
    orig_shape = x.shape
    dim = orig_shape[-1]
    x2d = x.reshape(-1, dim)
    n_rows = x2d.shape[0]

    if row_tile is None:
        row_tile = _pick_row_tile(n_rows, dim, jnp.dtype(x.dtype).itemsize)

    gamma2d = gamma.reshape(1, dim)
    beta2d = beta.reshape(1, dim)

    inv_n = 1.0 / float(dim)
    inv_nm1 = 1.0 / float(max(dim - 1, 1))
    kernel = functools.partial(
        _layernorm_kernel, epsilon=float(epsilon), inv_n=inv_n, inv_nm1=inv_nm1
    )

    # TODO(synk): for small dims (e.g. 32 < 128 lanes) a lane-dense layout packing
    # several logical rows per physical lane-row (with segmented reductions) would
    # avoid masked vst.msk stores; skipped here to keep row-wise semantics simple.
    out = pl.pallas_call(
        kernel,
        out_shape=jax.ShapeDtypeStruct((n_rows, dim), x.dtype),
        grid_spec=pltpu.PrefetchScalarGridSpec(
            num_scalar_prefetch=0,
            # No wrapper pad/slice: partial last block is read/written masked.
            grid=(pl.cdiv(n_rows, row_tile),),
            in_specs=[
                pl.BlockSpec((row_tile, dim), lambda i: (i, 0)),
                pl.BlockSpec((1, dim), lambda i: (0, 0)),
                pl.BlockSpec((1, dim), lambda i: (0, 0)),
            ],
            out_specs=pl.BlockSpec((row_tile, dim), lambda i: (i, 0)),
        ),
        compiler_params=pltpu.CompilerParams(
            dimension_semantics=("parallel",),
            vmem_limit_bytes=_VMEM_LIMIT_BYTES,
        ),
    )(x2d, gamma2d, beta2d)

    return out.reshape(orig_shape)


if __name__ == "__main__":
    # shapes implied by the module: (..., embedding_dim); use (batch=2, seq=8, hidden=32)
    batch, seq, hidden = 2, 8, 32
    key = jax.random.PRNGKey(0)
    x = jax.random.normal(key, (batch, seq, hidden), dtype=jnp.float32)

    # deterministic parameter init matching nn.Parameter(torch.ones/zeros(embedding_dim))
    gamma = jnp.ones((hidden,), dtype=jnp.float32)
    beta = jnp.zeros((hidden,), dtype=jnp.float32)

    out = layer_normalization(x, gamma, beta, epsilon=1e-5)
    out = jax.block_until_ready(out)

    # sanity check vs plain-JAX reference (unbiased variance, like torch.var default)
    mean = jnp.mean(x, axis=-1, keepdims=True)
    var = jnp.sum((x - mean) ** 2, axis=-1, keepdims=True) / (hidden - 1)
    ref = (x - mean) / jnp.sqrt(var + 1e-5) * gamma + beta
    assert jnp.allclose(out, ref, atol=1e-5, rtol=1e-5)

    print("KERNEL_OK")
</pallas_src>

<mosaic_0001>
module attributes {stable_mosaic.version = 11 : i64} {
  func.func @_layernorm_kernel(%arg0: i32, %arg1: memref<16x32xf32, #tpu.memory_space<vmem>>, %arg2: memref<1x32xf32, #tpu.memory_space<vmem>>, %arg3: memref<1x32xf32, #tpu.memory_space<vmem>>, %arg4: memref<16x32xf32, #tpu.memory_space<vmem>>) attributes {dimension_semantics = [#tpu.dimension_semantics<parallel>], iteration_bounds = array<i64: 1>, scalar_prefetch = 0 : i64, scratch_operands = 0 : i64, tpu.core_type = #tpu.core_type<tc>, window_params = [{transform_indices = @transform_0, window_bounds = array<i64: 16, 32>}, {pipeline_mode = #tpu.pipeline_mode<synchronous>, transform_indices = @transform_1, window_bounds = array<i64: 1, 32>}, {pipeline_mode = #tpu.pipeline_mode<synchronous>, transform_indices = @transform_2, window_bounds = array<i64: 1, 32>}, {transform_indices = @transform_3, window_bounds = array<i64: 16, 32>}]} {
    %c0 = arith.constant 0 : index
    %c0_0 = arith.constant 0 : index
    %0 = vector.load %arg1[%c0, %c0_0] : memref<16x32xf32, #tpu.memory_space<vmem>>, vector<16x32xf32>
    %cst = arith.constant dense<0.000000e+00> : vector<16xf32>
    %1 = vector.multi_reduction <add>, %0, %cst [1] : vector<16x32xf32> to vector<16xf32>
    %2 = vector.shape_cast %1 : vector<16xf32> to vector<16x1xf32>
    %cst_1 = arith.constant 3.125000e-02 : f32
    %3 = vector.broadcast %cst_1 : f32 to vector<16x1xf32>
    %4 = arith.mulf %2, %3 : vector<16x1xf32>
    %5 = vector.broadcast %4 : vector<16x1xf32> to vector<16x32xf32>
    %6 = arith.subf %0, %5 : vector<16x32xf32>
    %7 = arith.mulf %6, %6 : vector<16x32xf32>
    %cst_2 = arith.constant dense<0.000000e+00> : vector<16xf32>
    %8 = vector.multi_reduction <add>, %7, %cst_2 [1] : vector<16x32xf32> to vector<16xf32>
    %9 = vector.shape_cast %8 : vector<16xf32> to vector<16x1xf32>
    %cst_3 = arith.constant 0.0322580636 : f32
    %10 = vector.broadcast %cst_3 : f32 to vector<16x1xf32>
    %11 = arith.mulf %9, %10 : vector<16x1xf32>
    %cst_4 = arith.constant 9.99999974E-6 : f32
    %12 = vector.broadcast %cst_4 : f32 to vector<16x1xf32>
    %13 = arith.addf %11, %12 : vector<16x1xf32>
    %14 = math.rsqrt %13 : vector<16x1xf32>
    %c0_5 = arith.constant 0 : index
    %c0_6 = arith.constant 0 : index
    %15 = vector.load %arg2[%c0_5, %c0_6] : memref<1x32xf32, #tpu.memory_space<vmem>>, vector<1x32xf32>
    %c0_7 = arith.constant 0 : index
    %c0_8 = arith.constant 0 : index
    %16 = vector.load %arg3[%c0_7, %c0_8] : memref<1x32xf32, #tpu.memory_space<vmem>>, vector<1x32xf32>
    %17 = vector.broadcast %14 : vector<16x1xf32> to vector<16x32xf32>
    %18 = arith.mulf %6, %17 : vector<16x32xf32>
    %19 = vector.broadcast %15 : vector<1x32xf32> to vector<16x32xf32>
    %20 = arith.mulf %18, %19 : vector<16x32xf32>
    %21 = vector.broadcast %16 : vector<1x32xf32> to vector<16x32xf32>
    %22 = arith.addf %20, %21 : vector<16x32xf32>
    %c0_9 = arith.constant 0 : index
    %c0_10 = arith.constant 0 : index
    %23 = vector.load %arg4[%c0_9, %c0_10] : memref<16x32xf32, #tpu.memory_space<vmem>>, vector<16x32xf32>
    tpu.vector_store %arg4[%c0_9, %c0_10], %22 {strides = array<i32>} : memref<16x32xf32, #tpu.memory_space<vmem>>, vector<16x32xf32>,
    return
  }
  func.func @transform_0(%arg0: i32) -> (i32, i32) {
    %c0_i32 = arith.constant 0 : i32
    %c0_i32_0 = arith.constant 0 : i32
    return %arg0, %c0_i32 : i32, i32
  }
  func.func @transform_1(%arg0: i32) -> (i32, i32) {
    %c0_i32 = arith.constant 0 : i32
    %c0_i32_0 = arith.constant 0 : i32
    %c0_i32_1 = arith.constant 0 : i32
    return %c0_i32, %c0_i32_0 : i32, i32
  }
  func.func @transform_2(%arg0: i32) -> (i32, i32) {
    %c0_i32 = arith.constant 0 : i32
    %c0_i32_0 = arith.constant 0 : i32
    %c0_i32_1 = arith.constant 0 : i32
    return %c0_i32, %c0_i32_0 : i32, i32
  }
  func.func @transform_3(%arg0: i32) -> (i32, i32) {
    %c0_i32 = arith.constant 0 : i32
    %c0_i32_0 = arith.constant 0 : i32
    return %arg0, %c0_i32 : i32, i32
  }
}

</mosaic_0001>

<bundles_post_ra>
// kernel: tpu_custom_call.1
= control target key start
LH: loop header
LB: loop body
LE: loop exit
PB: predicated region body
PF: predicated region fallthrough
CT: control target
= control target key end

     0   :  { %8 = vsyncpa [#allocation3], 0  ;;  %s197_s0 = inlined_call_operand.hbm [shape: f32[16,32], index: 0, kind: input, shape index: {}]   ;;  %s198_s1 = inlined_call_operand.vmem [shape: f32[1,32], index: 1, kind: input, shape index: {}]   ;;  %s199_s2 = inlined_call_operand.vmem [shape: f32[1,32], index: 2, kind: input, shape index: {}]   ;;  %s200_s3 = inlined_call_operand.hbm [shape: f32[16,32], index: 3, kind: output, shape index: {}]  }
   0x1   :  { %9 = vsyncpa [#allocation4], 0  ;;  %s149_s12 = smov [#allocation2]  }
   0x2   :  { %s15_s13 = sshll.u32 %s149_s12, 4  ;;  %s16_s13 = int_to_ptr.vmem [resolvable:$true] %s15_s13 }
   0x3   :  { %s113_s14 = scalar_lea.vmem %s16_s13, 256  ;;  %p118_p1 = scmp.lt.s32.totalorder %s16_s13, %s16_s13 }
   0x4   :  { %p114_p0 = scmp.ne.s32.totalorder %s16_s13, %s113_s14  ;;  %p119_p2 = scmp.lt.s32.totalorder %s113_s14, %s113_s14 }
   0x6   :  { %p120_p3 = por %p119_p2, %p118_p1 }
   0x8   :  { %p121_p4 = pnand %p120_p3, %p114_p0 }
   0xa   :  { %124 = shalt.err (!%p121_p4)
}
   0xb   :  { %s150_s15 = smov 128   ;;  %s151_s16 = smov 8  }
   0xc   :  { %21 = dma.hbm_to_vmem [thread:$0]  %s197_s0, 256, %s16_s13, [#allocation3], %s150_s15, %s150_s15, %s151_s16  }
   0xd   :  { %145 = dma.done.wait [#allocation3], 256  }
   0xe   :  { %146 = vsyncadd [#allocation3], 4294967040  ;;  %vm31_vm0 = vcmask 261120   ;;  %v29_v0 = vld [vmem:[#allocation2] sm:$0xff]  ;;  %v30_v1 = vld [vmem:[#allocation2 + $0x8] sm:$0xff]  ;;  %s152_s22 = smov [#allocation5]  }
   0xf   :  { %v32_v2 = vsel %vm31_vm0, %v29_v0, 0.0  ;;  %v35_v3 = vsel %vm31_vm0, %v30_v1, 0.0  ;;  %v95_v21 = vld [vmem:[%s198_s1] ss:$0 sm:$0xff]  ;;  %s83_s23 = sshll.u32 %s152_s22, 4  ;;  %s84_s23 = int_to_ptr.vmem [resolvable:$true] %s83_s23 }
  0x10   :  { %33 = vadd.xlane.f32.xlu0 %v32_v2  ;;  %v96_v23 = vld [vmem:[%s199_s2] ss:$0 sm:$0xff]  ;;  %s125_s24 = scalar_lea.vmem %s84_s23, 256  ;;  %p130_p6 = scmp.lt.s32.totalorder %s84_s23, %s84_s23 }
  0x11   :  { %p126_p5 = scmp.ne.s32.totalorder %s84_s23, %s125_s24  ;;  %p131_p7 = scmp.lt.s32.totalorder %s125_s24, %s125_s24 }
  0x13   :  { %p132_p8 = por %p131_p7, %p130_p6 }
  0x14   :  { %36 = vadd.xlane.f32.xlu0 %v35_v3 }
  0x15   :  { %p133_p9 = pnand %p132_p8, %p126_p5 }
  0x99   :  { %v34_v4 = vpop.xlane.xlu0 %33 }
  0x9a   :  { %v38_v5 = vmul.f32 0.03125, %v34_v4 }
  0x9c   :  { %v40_v6 = vsub.f32 %v29_v0, %v38_v5 }
  0x9d   :  { %v37_v7 = vpop.xlane.xlu0 %36 }
  0x9e   :  { %v39_v8 = vmul.f32 0.03125, %v37_v7  ;;  %v42_v9 = vmul.f32 %v40_v6, %v40_v6 }
  0xa0   :  { %v41_v10 = vsub.f32 %v30_v1, %v39_v8  ;;  %v44_v11 = vsel %vm31_vm0, %v42_v9, 0.0 }
  0xa1   :  { %45 = vadd.xlane.f32.xlu1 %v44_v11 }
  0xa2   :  { %v43_v12 = vmul.f32 %v41_v10, %v41_v10 }
  0xa4   :  { %v47_v13 = vsel %vm31_vm0, %v43_v12, 0.0 }
  0xa5   :  { %48 = vadd.xlane.f32.xlu1 %v47_v13 }
 0x12a   :  { %v46_v14 = vpop.xlane.xlu1 %45 }
 0x12b   :  { %v50_v15 = vmul.f32 0.032258064, %v46_v14 }
 0x12d   :  { %v52_v16 = vadd.f32 1e-05, %v50_v15 }
 0x12e   :  { %v49_v17 = vpop.xlane.xlu1 %48 }
 0x12f   :  { %101 = vrsqrt.f32 %v52_v16  ;;  %v51_v18 = vmul.f32 0.032258064, %v49_v17 }
 0x131   :  { %v53_v19 = vadd.f32 1e-05, %v51_v18 }
 0x133   :  { %103 = vrsqrt.f32 %v53_v19 }
 0x13c   :  { %v102_v20 = vpop.eup %101 }
 0x13d   :  { %v58_v22 = vmul.f32 %v102_v20, %v40_v6 }
 0x13f   :  { %v66_v24 = vmul.f32 %v95_v21, %v58_v22 }
 0x140   :  { %v104_v25 = vpop.eup %103 }
 0x141   :  { %v59_v26 = vmul.f32 %v104_v25, %v41_v10  ;;  %v74_v27 = vadd.f32 %v96_v23, %v66_v24 }
 0x143   :  { %v67_v28 = vmul.f32 %v95_v21, %v59_v26  ;;  %76 = vst.msk [vmem:[#allocation5] sm:$0xff] %vm31_vm0, %v74_v27 }
 0x145   :  { %v75_v29 = vadd.f32 %v96_v23, %v67_v28 }
 0x147   :  { %77 = vst.msk [vmem:[#allocation5 + $0x8] sm:$0xff] %vm31_vm0, %v75_v29 }
 0x148   :  { %136 = shalt.err (!%p133_p9)
}
 0x149   :  { %89 = dma.vmem_to_hbm [thread:$0]  %s84_s23, 256, %s200_s3, [#allocation4], %s150_s15, %s150_s15, %s151_s16  }
 0x14a   :  { %147 = dma.done.wait [#allocation4], 256  }
 0x14b   :  { %148 = vsyncadd [#allocation4], 4294967040 }
 0x14c   :  { %93 = vsyncpa [#allocation3], 1 }
 0x14d   :  { %94 = vsyncpa [#allocation4], 1 }

</bundles_post_ra>
